<compile_context>
chip_gen: v7x
topology: tpu7x:2x2x1
jax: 0.10.0
libtpu: 0.0.40
codegen_flags: <defaults>
</compile_context>

<pallas_src>
import functools

import jax
import jax.numpy as jnp
from jax import lax
from jax.experimental import pallas as pl
from jax.experimental.pallas import tpu as pltpu

LANE = 128         # vreg lane width
SUBLANE = 8        # f32 sublane count
NUM_CLASSES = 5
NEG_INF = -1e30    # pad value for classifier-bias lanes (softmax -> 0)


def _round_up(x, m):
    return (x + m - 1) // m * m


@functools.lru_cache(maxsize=None)
def _chip_info():
    """(is_v5e, num_tensorcores_per_chip) from the local device kind."""
    try:
        kind = jax.devices()[0].device_kind.lower()
    except Exception:  # no devices visible at trace time
        kind = ""
    is_v5e = ("v5 lite" in kind) or ("v5e" in kind) or ("v5litepod" in kind)
    num_tc = 2 if "v7" in kind else 1
    return is_v5e, num_tc


def _pick_batch_tile(batch, is_v5e, num_tc):
    """Batch-tile rows: MXU-sized on v6e/v7x, >=2 grid steps on v7x."""
    if batch >= 256 and not is_v5e:
        tb = 256
    elif batch >= LANE:
        tb = LANE
    else:
        tb = _round_up(max(batch, 1), SUBLANE)
    # v7x megacore: halve the tile until both TensorCores get a grid step.
    while num_tc > 1 and tb > SUBLANE and _round_up(batch, tb) // tb < num_tc:
        tb = _round_up(tb // 2, SUBLANE)
    return tb


def _controller_kernel(r_ref, m_ref, w1r_ref, w1m_ref, b1_ref,
                       w2_ref, b2_ref, wc_ref, bc_ref,
                       strat_ref, probs_ref, tmax_ref, tidx_ref,
                       *, batch):
    mm_dt = w1r_ref.dtype

    # strategy_net layer 1: Linear(2H -> H) on concat(r, m) == r@W1r + m@W1m
    r = r_ref[...].astype(mm_dt)
    m = m_ref[...].astype(mm_dt)
    h1 = (jnp.dot(r, w1r_ref[...], preferred_element_type=jnp.float32)
          + jnp.dot(m, w1m_ref[...], preferred_element_type=jnp.float32)
          + b1_ref[...])
    h1 = jnp.maximum(h1, 0.0)                      # ReLU in f32 (VPU)

    # strategy_net layer 2: Linear(H -> H)
    strat = (jnp.dot(h1.astype(mm_dt), w2_ref[...],
                     preferred_element_type=jnp.float32) + b2_ref[...])
    strat_ref[...] = strat.astype(strat_ref.dtype)

    # reasoning_classifier + softmax (lane-dense 128-wide output).
    # Padded lanes carry bias NEG_INF -> exp == 0 -> prob == 0.
    logits = (jnp.dot(strat.astype(mm_dt), wc_ref[...],
                      preferred_element_type=jnp.float32) + bc_ref[...])
    mx = jnp.max(logits, axis=-1, keepdims=True)
    e = jnp.exp(logits - mx)
    denom = jnp.sum(e, axis=-1, keepdims=True)
    # EUP reciprocal for the returned probabilities (fast path).
    probs_ref[...] = (e * pl.reciprocal(denom, approx=True)).astype(probs_ref.dtype)

    # Flattened (B, 5) argmax, per batch tile.  Exact division here so the
    # cross-row comparison cannot flip on a near-tie vs. the reference.
    p = e / denom
    bt, cp = p.shape
    row_base = pl.program_id(0) * bt
    rows = lax.broadcasted_iota(jnp.int32, (bt, cp), 0) + row_base
    cols = lax.broadcasted_iota(jnp.int32, (bt, cp), 1)
    valid = (rows < batch) & (cols < NUM_CLASSES)
    p_m = jnp.where(valid, p, -1.0)
    # flattened index in the *unpadded* (B, 5) tensor; exact in f32 range
    flat = (rows * NUM_CLASSES + cols).astype(jnp.float32)

    tmax = jnp.max(jnp.max(p_m, axis=1, keepdims=True), axis=0, keepdims=True)
    cand = jnp.where(p_m == tmax, flat, jnp.float32(3.0e38))
    tidx = jnp.min(jnp.min(cand, axis=1, keepdims=True), axis=0, keepdims=True)

    # Tiny (8,128)-aligned per-tile stat blocks (value broadcast; only [0,0]
    # is consumed by the wrapper).
    tmax_ref[...] = jnp.broadcast_to(tmax, (SUBLANE, LANE))
    tidx_ref[...] = jnp.broadcast_to(tidx, (SUBLANE, LANE)).astype(jnp.int32)


@functools.partial(jax.jit, static_argnames=("out_dtype",))
def reasoning_controller_fwd(reasoning_state, memory_state, params,
                             out_dtype=jnp.float32):
    """Returns (strategy_output [B,H], probs [B,5], flattened argmax index).

    out_dtype: dtype of the strategy output (jnp.bfloat16 halves the largest
    HBM write if the downstream consumer tolerates it; default f32 matches
    the torch module).
    """
    B, H = reasoning_state.shape
    Hp = params["w1r"].shape[0]            # padded hidden (multiple of 128)
    Cp = params["wc"].shape[1]             # padded class dim (128)

    is_v5e, num_tc = _chip_info()
    tb = _pick_batch_tile(B, is_v5e, num_tc)
    Bp = _round_up(B, tb)
    grid = (Bp // tb,)
    aligned = (Bp == B) and (Hp == H)

    # Wrapper-side zero-pad only when the shapes actually need it.
    if aligned:
        r_in = reasoning_state.astype(jnp.float32)
        m_in = memory_state.astype(jnp.float32)
    else:
        r_in = (jnp.zeros((Bp, Hp), jnp.float32)
                .at[:B, :H].set(reasoning_state.astype(jnp.float32)))
        m_in = (jnp.zeros((Bp, Hp), jnp.float32)
                .at[:B, :H].set(memory_state.astype(jnp.float32)))

    # Scoped-VMEM limit sized to the actual footprint (single-buffered
    # weights + double-buffered activation / output tiles + margin).
    w_item = jnp.dtype(params["w1r"].dtype).itemsize
    weight_bytes = (3 * Hp * Hp + Hp * Cp) * w_item + (2 * Hp + Cp) * 4
    act_bytes = 2 * (2 * tb * Hp * 4)
    out_bytes = 2 * (tb * Hp * jnp.dtype(out_dtype).itemsize
                     + tb * Cp * 4 + 2 * SUBLANE * LANE * 4)
    vmem_limit = int(min(max(weight_bytes + act_bytes + out_bytes + (4 << 20),
                             32 << 20), 112 << 20))

    def row_spec(shape):
        return pl.BlockSpec(shape, lambda i: (i, 0))

    def rep_spec(shape):
        # Grid-invariant block (constant index_map): single-buffer it so the
        # default double-buffer allocation doesn't waste VMEM.
        return pl.BlockSpec(shape, lambda i: (0, 0),
                            pipeline_mode=pl.Buffered(1))

    kernel = functools.partial(_controller_kernel, batch=B)

    strat_pad, probs_pad, tile_max, tile_idx = pl.pallas_call(
        kernel,
        out_shape=(
            jax.ShapeDtypeStruct((Bp, Hp), out_dtype),
            jax.ShapeDtypeStruct((Bp, Cp), jnp.float32),
            jax.ShapeDtypeStruct((SUBLANE * grid[0], LANE), jnp.float32),
            jax.ShapeDtypeStruct((SUBLANE * grid[0], LANE), jnp.int32),
        ),
        grid=grid,
        in_specs=[
            row_spec((tb, Hp)),            # reasoning_state tile
            row_spec((tb, Hp)),            # memory_state tile
            rep_spec((Hp, Hp)),            # W1 (reasoning half)
            rep_spec((Hp, Hp)),            # W1 (memory half)
            rep_spec((1, Hp)),             # b1
            rep_spec((Hp, Hp)),            # W2
            rep_spec((1, Hp)),             # b2
            rep_spec((Hp, Cp)),            # classifier W (lane-dense)
            rep_spec((1, Cp)),             # classifier b (-1e30 padded)
        ],
        out_specs=(
            row_spec((tb, Hp)),
            row_spec((tb, Cp)),
            pl.BlockSpec((SUBLANE, LANE), lambda i: (i, 0)),
            pl.BlockSpec((SUBLANE, LANE), lambda i: (i, 0)),
        ),
        compiler_params=pltpu.CompilerParams(
            dimension_semantics=("parallel",),
            vmem_limit_bytes=vmem_limit),
    )(r_in, m_in, params["w1r"], params["w1m"], params["b1"],
      params["w2"], params["b2"], params["wc"], params["bc"])

    strat = strat_pad if aligned else strat_pad[:B, :H]
    probs = probs_pad[:B, :NUM_CLASSES]

    # Matches torch: reasoning_type.argmax() over the flattened (B, 5) tensor.
    if grid[0] == 1:
        reasoning_type_idx = tile_idx[0, 0]
    else:
        tm = tile_max[::SUBLANE, 0]        # (num_tiles,)
        ti = tile_idx[::SUBLANE, 0]        # (num_tiles,)
        reasoning_type_idx = ti[jnp.argmax(tm)]
    return strat, probs, reasoning_type_idx


def init_params(hidden_size: int, key):
    """Raw parameters mirroring the nn.Module (Linear weights pre-transposed)."""
    H = hidden_size
    ks = jax.random.split(key, 6)

    def uinit(k, shape, fan_in):
        bound = 1.0 / jnp.sqrt(fan_in)
        return jax.random.uniform(k, shape, jnp.float32, -bound, bound)

    return {
        "w1": uinit(ks[0], (2 * H, H), 2 * H),   # Linear(2H -> H), (in, out)
        "b1": uinit(ks[1], (H,), 2 * H),
        "w2": uinit(ks[2], (H, H), H),           # Linear(H -> H)
        "b2": uinit(ks[3], (H,), H),
        "wc": uinit(ks[4], (H, NUM_CLASSES), H), # Linear(H -> 5)
        "bc": uinit(ks[5], (NUM_CLASSES,), H),
    }


def prepare_params(raw, hidden_size: int, matmul_dtype=None):
    """Pad parameters to lane-dense shapes expected by the kernel.

    matmul_dtype is an explicit accuracy/perf knob:
      * None (default): bf16 MXU weights once Hp >= 256, else f32.
      * jnp.bfloat16: force bf16 at all sizes (recommended on v5e — f32
        matmuls there cost ~3x MXU passes and 2x weight DMA).
      * jnp.float32: force exact f32 everywhere.
    Accumulation is always f32.
    """
    H = hidden_size
    Hp = _round_up(H, LANE)
    Cp = _round_up(NUM_CLASSES, LANE)
    if matmul_dtype is None:
        matmul_dtype = jnp.bfloat16 if Hp >= 256 else jnp.float32

    def pad2(w, r, c, dtype):
        out = jnp.zeros((r, c), jnp.float32).at[:w.shape[0], :w.shape[1]].set(w)
        return out.astype(dtype)

    w1 = raw["w1"]
    return {
        "w1r": pad2(w1[:H], Hp, Hp, matmul_dtype),
        "w1m": pad2(w1[H:], Hp, Hp, matmul_dtype),
        "b1": pad2(raw["b1"][None, :], 1, Hp, jnp.float32),
        "w2": pad2(raw["w2"], Hp, Hp, matmul_dtype),
        "b2": pad2(raw["b2"][None, :], 1, Hp, jnp.float32),
        "wc": pad2(raw["wc"], Hp, Cp, matmul_dtype),
        "bc": jnp.full((1, Cp), NEG_INF, jnp.float32)
                 .at[0, :NUM_CLASSES].set(raw["bc"]),
    }


class ReasoningController:
    """JAX/Pallas counterpart of the torch module (keeps the step log)."""

    def __init__(self, hidden_size: int, key, matmul_dtype=None,
                 out_dtype=jnp.float32):
        self.hidden_size = hidden_size
        self.out_dtype = out_dtype
        self.raw_params = init_params(hidden_size, key)
        self.params = prepare_params(self.raw_params, hidden_size, matmul_dtype)
        self._step_indices = []            # device scalars, no host sync

    def __call__(self, reasoning_state, memory_state):
        strat, _probs, idx = reasoning_controller_fwd(
            reasoning_state, memory_state, self.params,
            out_dtype=self.out_dtype)
        # No .item()/int() here: keep the index on-device, format lazily.
        self._step_indices.append(idx)
        return strat

    def get_reasoning_steps(self):
        # Materialize lazily; replace device scalars with host ints so the
        # device buffers don't stay alive indefinitely.
        self._step_indices = [i if isinstance(i, int) else int(i)
                              for i in self._step_indices]
        return [f"推理类型: {i}" for i in self._step_indices]


if __name__ == "__main__":
    HIDDEN = 32
    BATCH = 2

    root = jax.random.PRNGKey(0)
    k_params, k_r, k_m = jax.random.split(root, 3)

    controller = ReasoningController(HIDDEN, k_params)

    reasoning_state = jax.random.normal(k_r, (BATCH, HIDDEN), jnp.float32)
    memory_state = jax.random.normal(k_m, (BATCH, HIDDEN), jnp.float32)

    strat = controller(reasoning_state, memory_state)
    strat = jax.block_until_ready(strat)

    # Pure-JAX reference from the raw (unpadded) parameters.
    p = controller.raw_params
    comb = jnp.concatenate([reasoning_state, memory_state], axis=-1)
    ref_strat = jnp.maximum(comb @ p["w1"] + p["b1"], 0.0) @ p["w2"] + p["b2"]
    ref_logits = ref_strat @ p["wc"] + p["bc"]
    ref_probs = jax.nn.softmax(ref_logits, axis=-1)

    _, probs, idx = reasoning_controller_fwd(
        reasoning_state, memory_state, controller.params)
    probs = jax.block_until_ready(probs)

    assert strat.shape == (BATCH, HIDDEN)
    assert probs.shape == (BATCH, NUM_CLASSES)
    assert jnp.allclose(strat, ref_strat, atol=1e-3), "strategy mismatch"
    assert jnp.allclose(probs, ref_probs, atol=2e-3), "softmax mismatch"
    assert int(idx) == int(jnp.argmax(ref_probs))
    assert len(controller.get_reasoning_steps()) == 1

    print("KERNEL_OK")
</pallas_src>

<mosaic_0001>
module attributes {stable_mosaic.version = 11 : i64} {
  func.func @_controller_kernel(%arg0: i32, %arg1: memref<8x128xf32, #tpu.memory_space<vmem>>, %arg2: memref<8x128xf32, #tpu.memory_space<vmem>>, %arg3: memref<128x128xf32, #tpu.memory_space<vmem>>, %arg4: memref<128x128xf32, #tpu.memory_space<vmem>>, %arg5: memref<1x128xf32, #tpu.memory_space<vmem>>, %arg6: memref<128x128xf32, #tpu.memory_space<vmem>>, %arg7: memref<1x128xf32, #tpu.memory_space<vmem>>, %arg8: memref<128x128xf32, #tpu.memory_space<vmem>>, %arg9: memref<1x128xf32, #tpu.memory_space<vmem>>, %arg10: memref<8x128xf32, #tpu.memory_space<vmem>>, %arg11: memref<8x128xf32, #tpu.memory_space<vmem>>, %arg12: memref<8x128xf32, #tpu.memory_space<vmem>>, %arg13: memref<8x128xi32, #tpu.memory_space<vmem>>) attributes {dimension_semantics = [#tpu.dimension_semantics<parallel>], iteration_bounds = array<i64: 1>, scalar_prefetch = 0 : i64, scratch_operands = 0 : i64, tpu.core_type = #tpu.core_type<tc>, window_params = [{transform_indices = @transform_0, window_bounds = array<i64: 8, 128>}, {transform_indices = @transform_1, window_bounds = array<i64: 8, 128>}, {pipeline_mode = #tpu.pipeline_mode<synchronous>, transform_indices = @transform_2, window_bounds = array<i64: 128, 128>}, {pipeline_mode = #tpu.pipeline_mode<synchronous>, transform_indices = @transform_3, window_bounds = array<i64: 128, 128>}, {pipeline_mode = #tpu.pipeline_mode<synchronous>, transform_indices = @transform_4, window_bounds = array<i64: 1, 128>}, {pipeline_mode = #tpu.pipeline_mode<synchronous>, transform_indices = @transform_5, window_bounds = array<i64: 128, 128>}, {pipeline_mode = #tpu.pipeline_mode<synchronous>, transform_indices = @transform_6, window_bounds = array<i64: 1, 128>}, {pipeline_mode = #tpu.pipeline_mode<synchronous>, transform_indices = @transform_7, window_bounds = array<i64: 128, 128>}, {pipeline_mode = #tpu.pipeline_mode<synchronous>, transform_indices = @transform_8, window_bounds = array<i64: 1, 128>}, {transform_indices = @transform_9, window_bounds = array<i64: 8, 128>}, {transform_indices = @transform_10, window_bounds = array<i64: 8, 128>}, {transform_indices = @transform_11, window_bounds = array<i64: 8, 128>}, {transform_indices = @transform_12, window_bounds = array<i64: 8, 128>}]} {
    %c0 = arith.constant 0 : index
    %c0_0 = arith.constant 0 : index
    %0 = vector.load %arg1[%c0, %c0_0] : memref<8x128xf32, #tpu.memory_space<vmem>>, vector<8x128xf32>
    %c0_1 = arith.constant 0 : index
    %c0_2 = arith.constant 0 : index
    %1 = vector.load %arg2[%c0_1, %c0_2] : memref<8x128xf32, #tpu.memory_space<vmem>>, vector<8x128xf32>
    %c0_3 = arith.constant 0 : index
    %c0_4 = arith.constant 0 : index
    %2 = vector.load %arg3[%c0_3, %c0_4] : memref<128x128xf32, #tpu.memory_space<vmem>>, vector<128x128xf32>
    %cst = arith.constant dense<0.000000e+00> : vector<8x128xf32>
    %3 = tpu.matmul %0, %2, %cst {dimension_numbers = #tpu.dot_dimension_numbers<[1], [0], [0], [1], [0, 0, 1, 1], [], []>} : vector<8x128xf32>, vector<128x128xf32>, vector<8x128xf32> -> vector<8x128xf32>
    %c0_5 = arith.constant 0 : index
    %c0_6 = arith.constant 0 : index
    %4 = vector.load %arg4[%c0_5, %c0_6] : memref<128x128xf32, #tpu.memory_space<vmem>>, vector<128x128xf32>
    %cst_7 = arith.constant dense<0.000000e+00> : vector<8x128xf32>
    %5 = tpu.matmul %1, %4, %cst_7 {dimension_numbers = #tpu.dot_dimension_numbers<[1], [0], [0], [1], [0, 0, 1, 1], [], []>} : vector<8x128xf32>, vector<128x128xf32>, vector<8x128xf32> -> vector<8x128xf32>
    %6 = arith.addf %3, %5 : vector<8x128xf32>
    %c0_8 = arith.constant 0 : index
    %c0_9 = arith.constant 0 : index
    %7 = vector.load %arg5[%c0_8, %c0_9] : memref<1x128xf32, #tpu.memory_space<vmem>>, vector<1x128xf32>
    %8 = vector.broadcast %7 : vector<1x128xf32> to vector<8x128xf32>
    %9 = arith.addf %6, %8 : vector<8x128xf32>
    %cst_10 = arith.constant 0.000000e+00 : f32
    %10 = vector.broadcast %cst_10 : f32 to vector<8x128xf32>
    %11 = arith.maximumf %9, %10 : vector<8x128xf32>
    %c0_11 = arith.constant 0 : index
    %c0_12 = arith.constant 0 : index
    %12 = vector.load %arg6[%c0_11, %c0_12] : memref<128x128xf32, #tpu.memory_space<vmem>>, vector<128x128xf32>
    %cst_13 = arith.constant dense<0.000000e+00> : vector<8x128xf32>
    %13 = tpu.matmul %11, %12, %cst_13 {dimension_numbers = #tpu.dot_dimension_numbers<[1], [0], [0], [1], [0, 0, 1, 1], [], []>} : vector<8x128xf32>, vector<128x128xf32>, vector<8x128xf32> -> vector<8x128xf32>
    %c0_14 = arith.constant 0 : index
    %c0_15 = arith.constant 0 : index
    %14 = vector.load %arg7[%c0_14, %c0_15] : memref<1x128xf32, #tpu.memory_space<vmem>>, vector<1x128xf32>
    %15 = vector.broadcast %14 : vector<1x128xf32> to vector<8x128xf32>
    %16 = arith.addf %13, %15 : vector<8x128xf32>
    %c0_16 = arith.constant 0 : index
    %c0_17 = arith.constant 0 : index
    %17 = vector.load %arg10[%c0_16, %c0_17] : memref<8x128xf32, #tpu.memory_space<vmem>>, vector<8x128xf32>
    tpu.vector_store %arg10[%c0_16, %c0_17], %16 {strides = array<i32>} : memref<8x128xf32, #tpu.memory_space<vmem>>, vector<8x128xf32>,
    %c0_18 = arith.constant 0 : index
    %c0_19 = arith.constant 0 : index
    %18 = vector.load %arg8[%c0_18, %c0_19] : memref<128x128xf32, #tpu.memory_space<vmem>>, vector<128x128xf32>
    %cst_20 = arith.constant dense<0.000000e+00> : vector<8x128xf32>
    %19 = tpu.matmul %16, %18, %cst_20 {dimension_numbers = #tpu.dot_dimension_numbers<[1], [0], [0], [1], [0, 0, 1, 1], [], []>} : vector<8x128xf32>, vector<128x128xf32>, vector<8x128xf32> -> vector<8x128xf32>
    %c0_21 = arith.constant 0 : index
    %c0_22 = arith.constant 0 : index
    %20 = vector.load %arg9[%c0_21, %c0_22] : memref<1x128xf32, #tpu.memory_space<vmem>>, vector<1x128xf32>
    %21 = vector.broadcast %20 : vector<1x128xf32> to vector<8x128xf32>
    %22 = arith.addf %19, %21 : vector<8x128xf32>
    %cst_23 = arith.constant dense<0xFF800000> : vector<8xf32>
    %23 = vector.multi_reduction <maximumf>, %22, %cst_23 [1] : vector<8x128xf32> to vector<8xf32>
    %24 = vector.shape_cast %23 : vector<8xf32> to vector<8x1xf32>
    %25 = vector.broadcast %24 : vector<8x1xf32> to vector<8x128xf32>
    %26 = arith.subf %22, %25 : vector<8x128xf32>
    %27 = math.exp %26 : vector<8x128xf32>
    %cst_24 = arith.constant dense<0.000000e+00> : vector<8xf32>
    %28 = vector.multi_reduction <add>, %27, %cst_24 [1] : vector<8x128xf32> to vector<8xf32>
    %29 = vector.shape_cast %28 : vector<8xf32> to vector<8x1xf32>
    %30 = tpu.reciprocal %29 {approx = true} : vector<8x1xf32> -> vector<8x1xf32>
    %31 = vector.broadcast %30 : vector<8x1xf32> to vector<8x128xf32>
    %32 = arith.mulf %27, %31 : vector<8x128xf32>
    %c0_25 = arith.constant 0 : index
    %c0_26 = arith.constant 0 : index
    %33 = vector.load %arg11[%c0_25, %c0_26] : memref<8x128xf32, #tpu.memory_space<vmem>>, vector<8x128xf32>
    tpu.vector_store %arg11[%c0_25, %c0_26], %32 {strides = array<i32>} : memref<8x128xf32, #tpu.memory_space<vmem>>, vector<8x128xf32>,
    %34 = vector.broadcast %29 : vector<8x1xf32> to vector<8x128xf32>
    %35 = arith.divf %27, %34 : vector<8x128xf32>
    %c8_i32 = arith.constant 8 : i32
    %36 = arith.muli %arg0, %c8_i32 : i32
    %37 = tpu.iota {dimensions = array<i32: 0>} : vector<8x128xi32>
    %38 = vector.broadcast %36 : i32 to vector<8x128xi32>
    %39 = arith.addi %37, %38 : vector<8x128xi32>
    %40 = tpu.iota {dimensions = array<i32: 1>} : vector<8x128xi32>
    %c2_i32 = arith.constant 2 : i32
    %41 = vector.broadcast %c2_i32 : i32 to vector<8x128xi32>
    %42 = arith.cmpi slt, %39, %41 : vector<8x128xi32>
    %c5_i32 = arith.constant 5 : i32
    %43 = vector.broadcast %c5_i32 : i32 to vector<8x128xi32>
    %44 = arith.cmpi slt, %40, %43 : vector<8x128xi32>
    %45 = arith.andi %42, %44 : vector<8x128xi1>
    %cst_27 = arith.constant -1.000000e+00 : f32
    %46 = vector.broadcast %cst_27 : f32 to vector<8x128xf32>
    %47 = arith.select %45, %35, %46 : vector<8x128xi1>, vector<8x128xf32>
    %c5_i32_28 = arith.constant 5 : i32
    %48 = vector.broadcast %c5_i32_28 : i32 to vector<8x128xi32>
    %49 = arith.muli %39, %48 : vector<8x128xi32>
    %50 = arith.addi %49, %40 : vector<8x128xi32>
    %51 = arith.sitofp %50 : vector<8x128xi32> to vector<8x128xf32>
    %cst_29 = arith.constant dense<0xFF800000> : vector<8xf32>
    %52 = vector.multi_reduction <maximumf>, %47, %cst_29 [1] : vector<8x128xf32> to vector<8xf32>
    %53 = vector.shape_cast %52 : vector<8xf32> to vector<8x1xf32>
    %cst_30 = arith.constant dense<0xFF800000> : vector<1xf32>
    %54 = vector.multi_reduction <maximumf>, %53, %cst_30 [0] : vector<8x1xf32> to vector<1xf32>
    %55 = vector.shape_cast %54 : vector<1xf32> to vector<1x1xf32>
    %56 = vector.broadcast %55 : vector<1x1xf32> to vector<8x128xf32>
    %57 = arith.cmpf oeq, %47, %56 : vector<8x128xf32>
    %cst_31 = arith.constant 3.000000e+38 : f32
    %58 = vector.broadcast %cst_31 : f32 to vector<8x128xf32>
    %59 = arith.select %57, %51, %58 : vector<8x128xi1>, vector<8x128xf32>
    %cst_32 = arith.constant dense<0x7F800000> : vector<8xf32>
    %60 = vector.multi_reduction <minimumf>, %59, %cst_32 [1] : vector<8x128xf32> to vector<8xf32>
    %61 = vector.shape_cast %60 : vector<8xf32> to vector<8x1xf32>
    %cst_33 = arith.constant dense<0x7F800000> : vector<1xf32>
    %62 = vector.multi_reduction <minimumf>, %61, %cst_33 [0] : vector<8x1xf32> to vector<1xf32>
    %63 = vector.shape_cast %62 : vector<1xf32> to vector<1x1xf32>
    %64 = vector.shape_cast %55 : vector<1x1xf32> to vector<1x1xf32>
    %65 = vector.broadcast %64 : vector<1x1xf32> to vector<8x128xf32>
    %c0_34 = arith.constant 0 : index
    %c0_35 = arith.constant 0 : index
    %66 = vector.load %arg12[%c0_34, %c0_35] : memref<8x128xf32, #tpu.memory_space<vmem>>, vector<8x128xf32>
    tpu.vector_store %arg12[%c0_34, %c0_35], %65 {strides = array<i32>} : memref<8x128xf32, #tpu.memory_space<vmem>>, vector<8x128xf32>,
    %67 = vector.shape_cast %63 : vector<1x1xf32> to vector<1x1xf32>
    %68 = vector.broadcast %67 : vector<1x1xf32> to vector<8x128xf32>
    %69 = arith.fptosi %68 : vector<8x128xf32> to vector<8x128xi32>
    %c0_36 = arith.constant 0 : index
    %c0_37 = arith.constant 0 : index
    %70 = vector.load %arg13[%c0_36, %c0_37] : memref<8x128xi32, #tpu.memory_space<vmem>>, vector<8x128xi32>
    tpu.vector_store %arg13[%c0_36, %c0_37], %69 {strides = array<i32>} : memref<8x128xi32, #tpu.memory_space<vmem>>, vector<8x128xi32>,
    return
  }
  func.func @transform_0(%arg0: i32) -> (i32, i32) {
    %c0_i32 = arith.constant 0 : i32
    %c0_i32_0 = arith.constant 0 : i32
    return %arg0, %c0_i32 : i32, i32
  }
  func.func @transform_1(%arg0: i32) -> (i32, i32) {
    %c0_i32 = arith.constant 0 : i32
    %c0_i32_0 = arith.constant 0 : i32
    return %arg0, %c0_i32 : i32, i32
  }
  func.func @transform_2(%arg0: i32) -> (i32, i32) {
    %c0_i32 = arith.constant 0 : i32
    %c0_i32_0 = arith.constant 0 : i32
    %c0_i32_1 = arith.constant 0 : i32
    return %c0_i32, %c0_i32_0 : i32, i32
  }
  func.func @transform_3(%arg0: i32) -> (i32, i32) {
    %c0_i32 = arith.constant 0 : i32
    %c0_i32_0 = arith.constant 0 : i32
    %c0_i32_1 = arith.constant 0 : i32
    return %c0_i32, %c0_i32_0 : i32, i32
  }
  func.func @transform_4(%arg0: i32) -> (i32, i32) {
    %c0_i32 = arith.constant 0 : i32
    %c0_i32_0 = arith.constant 0 : i32
    %c0_i32_1 = arith.constant 0 : i32
    return %c0_i32, %c0_i32_0 : i32, i32
  }
  func.func @transform_5(%arg0: i32) -> (i32, i32) {
    %c0_i32 = arith.constant 0 : i32
    %c0_i32_0 = arith.constant 0 : i32
    %c0_i32_1 = arith.constant 0 : i32
    return %c0_i32, %c0_i32_0 : i32, i32
  }
  func.func @transform_6(%arg0: i32) -> (i32, i32) {
    %c0_i32 = arith.constant 0 : i32
    %c0_i32_0 = arith.constant 0 : i32
    %c0_i32_1 = arith.constant 0 : i32
    return %c0_i32, %c0_i32_0 : i32, i32
  }
  func.func @transform_7(%arg0: i32) -> (i32, i32) {
    %c0_i32 = arith.constant 0 : i32
    %c0_i32_0 = arith.constant 0 : i32
    %c0_i32_1 = arith.constant 0 : i32
    return %c0_i32, %c0_i32_0 : i32, i32
  }
  func.func @transform_8(%arg0: i32) -> (i32, i32) {
    %c0_i32 = arith.constant 0 : i32
    %c0_i32_0 = arith.constant 0 : i32
    %c0_i32_1 = arith.constant 0 : i32
    return %c0_i32, %c0_i32_0 : i32, i32
  }
  func.func @transform_9(%arg0: i32) -> (i32, i32) {
    %c0_i32 = arith.constant 0 : i32
    %c0_i32_0 = arith.constant 0 : i32
    return %arg0, %c0_i32 : i32, i32
  }
  func.func @transform_10(%arg0: i32) -> (i32, i32) {
    %c0_i32 = arith.constant 0 : i32
    %c0_i32_0 = arith.constant 0 : i32
    return %arg0, %c0_i32 : i32, i32
  }
  func.func @transform_11(%arg0: i32) -> (i32, i32) {
    %c0_i32 = arith.constant 0 : i32
    %c0_i32_0 = arith.constant 0 : i32
    return %arg0, %c0_i32 : i32, i32
  }
  func.func @transform_12(%arg0: i32) -> (i32, i32) {
    %c0_i32 = arith.constant 0 : i32
    %c0_i32_0 = arith.constant 0 : i32
    return %arg0, %c0_i32 : i32, i32
  }
}

</mosaic_0001>

<bundles_post_ra>
// kernel: reasoning_controller_fwd.1
= control target key start
LH: loop header
LB: loop body
LE: loop exit
PB: predicated region body
PF: predicated region fallthrough
CT: control target
= control target key end

     0   :  { %18 = vsyncpa [#allocation3], 0  ;;  %s1204_s0 = inlined_call_operand.vmem [shape: f32[8,128], index: 0, kind: input, shape index: {}]   ;;  %s1205_s1 = inlined_call_operand.vmem [shape: f32[8,128], index: 1, kind: input, shape index: {}]   ;;  %s1206_s2 = inlined_call_operand.hbm [shape: f32[128,128], index: 2, kind: input, shape index: {}]   ;;  %s1207_s3 = inlined_call_operand.hbm [shape: f32[128,128], index: 3, kind: input, shape index: {}]   ;;  %s1208_s4 = inlined_call_operand.vmem [shape: f32[1,128], index: 4, kind: input, shape index: {}]   ;;  %s1209_s5 = inlined_call_operand.hbm [shape: f32[128,128], index: 5, kind: input, shape index: {}]   ;;  %s1210_s6 = inlined_call_operand.vmem [shape: f32[1,128], index: 6, kind: input, shape index: {}]   ;;  %s1211_s7 = inlined_call_operand.hbm [shape: f32[128,128], index: 7, kind: input, shape index: {}]   ;;  %s1212_s8 = inlined_call_operand.vmem [shape: f32[1,128], index: 8, kind: input, shape index: {}]   ;;  %s1213_s9 = inlined_call_operand.vmem [shape: f32[8,128], index: 9, kind: output, shape index: {0}]   ;;  %s1214_s10 = inlined_call_operand.vmem [shape: f32[8,128], index: 10, kind: output, shape index: {1}]   ;;  %s1215_s11 = inlined_call_operand.hbm [shape: f32[8,128], index: 11, kind: output, shape index: {2}]   ;;  %s1216_s12 = inlined_call_operand.vmem [shape: s32[8,128], index: 12, kind: output, shape index: {3}]  }
   0x1   :  { %19 = vsyncpa [#allocation6], 0 }
   0x2   :  { %20 = vsyncpa [#allocation9], 0 }
   0x3   :  { %21 = vsyncpa [#allocation4], 0  ;;  %s979_s21 = smov [#allocation5]   ;;  %s980_s23 = smov [#allocation2]  }
   0x4   :  { %s43_s22 = sshll.u32 %s979_s21, 4  ;;  %s31_s24 = sshll.u32 %s980_s23, 4  ;;  %s44_s22 = int_to_ptr.vmem [resolvable:$true] %s43_s22  ;;  %s1054_s24 = int_to_ptr.vmem [resolvable:$true] %s31_s24 }
   0x5   :  { %s861_s27 = scalar_lea.hbm %s1207_s3, 2048 }
   0x6   :  { %p862_p0 = scmp.ne.s32.totalorder %s1207_s3, %s861_s27  ;;  %p865_p1 = scmp.lt.u32.totalorder %s861_s27, %s1207_s3 }
   0x8   :  { %p867_p2 = pnand %p865_p1, %p862_p0 }
   0xa   :  { %870 = shalt.err (!%p867_p2)
}
   0xb   :  { %s871_s14 = scalar_lea.vmem %s44_s22, 2048  ;;  %p876_p4 = scmp.lt.s32.totalorder %s44_s22, %s44_s22 }
   0xc   :  { %p872_p3 = scmp.ne.s32.totalorder %s44_s22, %s871_s14  ;;  %p877_p5 = scmp.lt.s32.totalorder %s871_s14, %s871_s14 }
   0xe   :  { %p878_p6 = por %p877_p5, %p876_p4 }
  0x10   :  { %p879_p7 = pnand %p878_p6, %p872_p3 }
  0x12   :  { %882 = shalt.err (!%p879_p7)
}
  0x13   :  { %s981_s15 = smov 128   ;;  %s982_s16 = smov 8  }
  0x14   :  { %49 = dma.hbm_to_vmem [thread:$0]  %s1207_s3, 2048, %s44_s22, [#allocation6], %s981_s15, %s981_s15, %s982_s16  }
  0x15   :  { %s883_s21 = scalar_lea.hbm %s1206_s2, 2048 }
  0x16   :  { %p884_p8 = scmp.ne.s32.totalorder %s1206_s2, %s883_s21  ;;  %p887_p9 = scmp.lt.u32.totalorder %s883_s21, %s1206_s2 }
  0x18   :  { %p889_p10 = pnand %p887_p9, %p884_p8 }
  0x1a   :  { %892 = shalt.err (!%p889_p10)
}
  0x1b   :  { %s893_s28 = scalar_lea.vmem %s1054_s24, 2048  ;;  %p898_p12 = scmp.lt.s32.totalorder %s1054_s24, %s1054_s24 }
  0x1c   :  { %p894_p11 = scmp.ne.s32.totalorder %s1054_s24, %s893_s28  ;;  %p899_p13 = scmp.lt.s32.totalorder %s893_s28, %s893_s28 }
  0x1e   :  { %p900_p0 = por %p899_p13, %p898_p12 }
  0x20   :  { %p901_p1 = pnand %p900_p0, %p894_p11 }
  0x22   :  { %904 = shalt.err (!%p901_p1)
}
  0x23   :  { %37 = dma.hbm_to_vmem [thread:$0]  %s1206_s2, 2048, %s1054_s24, [#allocation3], %s981_s15, %s981_s15, %s982_s16  }
  0x24   :  { %s983_s29 = smov [#allocation7]   ;;  %s984_s13 = smov [#allocation8]  }
  0x25   :  { %s57_s30 = sshll.u32 %s983_s29, 4  ;;  %s71_s14 = sshll.u32 %s984_s13, 4  ;;  %s58_s30 = int_to_ptr.vmem [resolvable:$true] %s57_s30  ;;  %s1091_s14 = int_to_ptr.vmem [resolvable:$true] %s71_s14 }
  0x26   :  { %s905_s19 = scalar_lea.hbm %s1209_s5, 2048 }
  0x27   :  { %p906_p2 = scmp.ne.s32.totalorder %s1209_s5, %s905_s19  ;;  %p909_p3 = scmp.lt.u32.totalorder %s905_s19, %s1209_s5 }
  0x29   :  { %p911_p4 = pnand %p909_p3, %p906_p2 }
  0x2b   :  { %914 = shalt.err (!%p911_p4)
}
  0x2c   :  { %s915_s2 = scalar_lea.vmem %s58_s30, 2048  ;;  %p920_p6 = scmp.lt.s32.totalorder %s58_s30, %s58_s30 }
  0x2d   :  { %p916_p5 = scmp.ne.s32.totalorder %s58_s30, %s915_s2  ;;  %p921_p7 = scmp.lt.s32.totalorder %s915_s2, %s915_s2 }
  0x2f   :  { %p922_p8 = por %p921_p7, %p920_p6 }
  0x31   :  { %p923_p9 = pnand %p922_p8, %p916_p5 }
  0x33   :  { %926 = shalt.err (!%p923_p9)
}
  0x34   :  { %63 = dma.hbm_to_vmem [thread:$0]  %s1209_s5, 2048, %s58_s30, [#allocation6], %s981_s15, %s981_s15, %s982_s16  }
  0x35   :  { %s927_s3 = scalar_lea.hbm %s1211_s7, 2048 }
  0x36   :  { %p928_p10 = scmp.ne.s32.totalorder %s1211_s7, %s927_s3  ;;  %p931_p11 = scmp.lt.u32.totalorder %s927_s3, %s1211_s7 }
  0x38   :  { %p933_p12 = pnand %p931_p11, %p928_p10 }
  0x3a   :  { %936 = shalt.err (!%p933_p12)
}
  0x3b   :  { %s937_s18 = scalar_lea.vmem %s1091_s14, 2048  ;;  %p942_p0 = scmp.lt.s32.totalorder %s1091_s14, %s1091_s14 }
  0x3c   :  { %p938_p13 = scmp.ne.s32.totalorder %s1091_s14, %s937_s18  ;;  %p943_p1 = scmp.lt.s32.totalorder %s937_s18, %s937_s18 }
  0x3e   :  { %p944_p2 = por %p943_p1, %p942_p0 }
  0x40   :  { %p945_p3 = pnand %p944_p2, %p938_p13 }
  0x42   :  { %948 = shalt.err (!%p945_p3)
}
  0x43   :  { %77 = dma.hbm_to_vmem [thread:$0]  %s1211_s7, 2048, %s1091_s14, [#allocation9], %s981_s15, %s981_s15, %s982_s16  }
  0x44   :  { %971 = dma.done.wait [#allocation3], 2048  }
  0x45   :  { %972 = vsyncadd [#allocation3], 4294965248 }
  0x46   :  { %973 = dma.done.wait [#allocation6], 4096  }
  0x47   :  { %974 = vsyncadd [#allocation6], 4294963200 }
  0x48   :  { %975 = dma.done.wait [#allocation9], 2048  }
  0x49   :  { %976 = vsyncadd [#allocation9], 4294965248  ;;  %v985_v0 = vmov 0.0|0.0   ;;  %vm986_vm0 = vmmov 0   ;;  %v987_v1 = vmov 0.0   ;;  %v110_v2 = vld [vmem:[#allocation5] sm:$0xff] }
  0x4a   :  { %749 = vmatprep.subr.bf16.mxu0 %v985_v0  ;;  %773 = vmatprep.subr.bf16.mxu1 %v985_v0  ;;  %v111_v3 = vld [vmem:[#allocation5 + $0x8] sm:$0xff]  ;;  %v94_v4 = vld [vmem:[#allocation2] sm:$0xff]  ;;  %v112_v7 = vld [vmem:[#allocation5 + $0x10] sm:$0xff] }
  0x4b   :  { %641 = vmatprep.mubr.msk.f32.mxu0 %vm986_vm0, %v987_v1  ;;  %676 = vmatprep.mubr.msk.f32.mxu1 %vm986_vm0, %v987_v1  ;;  %v750_v5 = vpack.c.bf16 %v111_v3, %v110_v2  ;;  %v95_v6 = vld [vmem:[#allocation2 + $0x8] sm:$0xff]  ;;  %v113_v8 = vld [vmem:[#allocation5 + $0x18] sm:$0xff]  ;;  %v96_v10 = vld [vmem:[#allocation2 + $0x10] sm:$0xff] }
  0x4c   :  { %v774_v9 = vpack.c.bf16 %v95_v6, %v94_v4  ;;  %v97_v11 = vld [vmem:[#allocation2 + $0x18] sm:$0xff]  ;;  %v753_v12 = vpack.c.bf16 %v113_v8, %v112_v7  ;;  %v114_v14 = vld [vmem:[#allocation5 + $0x20] sm:$0xff]  ;;  %v115_v15 = vld [vmem:[#allocation5 + $0x28] sm:$0xff] }
  0x4d   :  { %751 = vmatpush3.bf16.msra.mxu0 %v750_v5  ;;  %v777_v13 = vpack.c.bf16 %v97_v11, %v96_v10  ;;  %v98_v16 = vld [vmem:[#allocation2 + $0x20] sm:$0xff]  ;;  %v99_v17 = vld [vmem:[#allocation2 + $0x28] sm:$0xff]  ;;  %v756_v18 = vpack.c.bf16 %v115_v15, %v114_v14  ;;  %v116_v20 = vld [vmem:[#allocation5 + $0x30] sm:$0xff] }
  0x4e   :  { %775 = vmatpush3.bf16.msra.mxu1 %v774_v9  ;;  %752 = vmatprep.subr.bf16.mxu0 %v985_v0  ;;  %v780_v19 = vpack.c.bf16 %v99_v17, %v98_v16  ;;  %v117_v21 = vld [vmem:[#allocation5 + $0x38] sm:$0xff]  ;;  %v100_v22 = vld [vmem:[#allocation2 + $0x30] sm:$0xff]  ;;  %v118_v26 = vld [vmem:[#allocation5 + $0x40] sm:$0xff] }
  0x4f   :  { %776 = vmatprep.subr.bf16.mxu1 %v985_v0  ;;  %v101_v23 = vld [vmem:[#allocation2 + $0x38] sm:$0xff]  ;;  %v759_v24 = vpack.c.bf16 %v117_v21, %v116_v20  ;;  %v119_v27 = vld [vmem:[#allocation5 + $0x48] sm:$0xff]  ;;  %v102_v28 = vld [vmem:[#allocation2 + $0x40] sm:$0xff] }
  0x50   :  { %v783_v25 = vpack.c.bf16 %v101_v23, %v100_v22  ;;  %v103_v29 = vld [vmem:[#allocation2 + $0x48] sm:$0xff]  ;;  %v762_v30 = vpack.c.bf16 %v119_v27, %v118_v26  ;;  %v120_v32 = vld [vmem:[#allocation5 + $0x50] sm:$0xff]  ;;  %v121_v33 = vld [vmem:[#allocation5 + $0x58] sm:$0xff] }
  0x51   :  { %754 = vmatpush3.bf16.msra.mxu0 %v753_v12  ;;  %v786_v31 = vpack.c.bf16 %v103_v29, %v102_v28  ;;  %v104_v34 = vld [vmem:[#allocation2 + $0x50] sm:$0xff]  ;;  %v105_v35 = vld [vmem:[#allocation2 + $0x58] sm:$0xff]  ;;  %v765_v36 = vpack.c.bf16 %v121_v33, %v120_v32  ;;  %v122_v38 = vld [vmem:[#allocation5 + $0x60] sm:$0xff] }
  0x52   :  { %778 = vmatpush3.bf16.msra.mxu1 %v777_v13  ;;  %755 = vmatprep.subr.bf16.mxu0 %v985_v0  ;;  %v789_v37 = vpack.c.bf16 %v105_v35, %v104_v34  ;;  %v123_v39 = vld [vmem:[#allocation5 + $0x68] sm:$0xff]  ;;  %v106_v40 = vld [vmem:[#allocation2 + $0x60] sm:$0xff]  ;;  %v124_v44 = vld [vmem:[#allocation5 + $0x70] sm:$0xff] }
  0x53   :  { %779 = vmatprep.subr.bf16.mxu1 %v985_v0  ;;  %v107_v41 = vld [vmem:[#allocation2 + $0x68] sm:$0xff]  ;;  %v768_v42 = vpack.c.bf16 %v123_v39, %v122_v38  ;;  %v125_v45 = vld [vmem:[#allocation5 + $0x78] sm:$0xff]  ;;  %v108_v46 = vld [vmem:[#allocation2 + $0x70] sm:$0xff] }
  0x54   :  { %v792_v43 = vpack.c.bf16 %v107_v41, %v106_v40  ;;  %v109_v47 = vld [vmem:[#allocation2 + $0x78] sm:$0xff]  ;;  %v771_v48 = vpack.c.bf16 %v125_v45, %v124_v44  ;;  %v275_v50 = vld [vmem:[#allocation7] sm:$0xff]  ;;  %v276_v51 = vld [vmem:[#allocation7 + $0x8] sm:$0xff] }
  0x55   :  { %757 = vmatpush3.bf16.msra.mxu0 %v756_v18  ;;  %v795_v49 = vpack.c.bf16 %v109_v47, %v108_v46  ;;  %v93_v52 = vld [vmem:[%s1205_s1] sm:$0xff]  ;;  %v798_v53 = vpack.c.bf16 %v276_v51, %v275_v50  ;;  %v277_v55 = vld [vmem:[#allocation7 + $0x10] sm:$0xff]  ;;  %v278_v56 = vld [vmem:[#allocation7 + $0x18] sm:$0xff] }
  0x56   :  { %781 = vmatpush3.bf16.msra.mxu1 %v780_v19  ;;  %758 = vmatprep.subr.bf16.mxu0 %v985_v0  ;;  %v92_v54 = vld [vmem:[%s1204_s0] sm:$0xff]  ;;  %v801_v57 = vpack.c.bf16 %v278_v56, %v277_v55  ;;  %v280_v59 = vld [vmem:[#allocation7 + $0x28] sm:$0xff]  ;;  %v281_v61 = vld [vmem:[#allocation7 + $0x30] sm:$0xff] }
  0x57   :  { %782 = vmatprep.subr.bf16.mxu1 %v985_v0  ;;  %v279_v58 = vld [vmem:[#allocation7 + $0x20] sm:$0xff]  ;;  %v282_v62 = vld [vmem:[#allocation7 + $0x38] sm:$0xff]  ;;  %v284_v3 = vld [vmem:[#allocation7 + $0x48] sm:$0xff] }
  0x58   :  { %v804_v60 = vpack.c.bf16 %v280_v59, %v279_v58  ;;  %v807_v63 = vpack.c.bf16 %v282_v62, %v281_v61  ;;  %v283_v2 = vld [vmem:[#allocation7 + $0x40] sm:$0xff]  ;;  %v285_v5 = vld [vmem:[#allocation7 + $0x50] sm:$0xff]  ;;  %v286_v6 = vld [vmem:[#allocation7 + $0x58] sm:$0xff] }
  0x59   :  { %760 = vmatpush3.bf16.msra.mxu0 %v759_v24  ;;  %v810_v4 = vpack.c.bf16 %v284_v3, %v283_v2  ;;  %v287_v7 = vld [vmem:[#allocation7 + $0x60] sm:$0xff]  ;;  %v288_v8 = vld [vmem:[#allocation7 + $0x68] sm:$0xff]  ;;  %v289_v10 = vld [vmem:[#allocation7 + $0x70] sm:$0xff] }
  0x5a   :  { %784 = vmatpush3.bf16.msra.mxu1 %v783_v25  ;;  %761 = vmatprep.subr.bf16.mxu0 %v985_v0  ;;  %v816_v9 = vpack.c.bf16 %v288_v8, %v287_v7  ;;  %v290_v11 = vld [vmem:[#allocation7 + $0x78] sm:$0xff]  ;;  %v369_v13 = vld [vmem:[#allocation8] sm:$0xff]  ;;  %v370_v14 = vld [vmem:[#allocation8 + $0x8] sm:$0xff] }
  0x5b   :  { %785 = vmatprep.subr.bf16.mxu1 %v985_v0  ;;  %v819_v12 = vpack.c.bf16 %v290_v11, %v289_v10  ;;  %v371_v15 = vld [vmem:[#allocation8 + $0x10] sm:$0xff]  ;;  %v822_v16 = vpack.c.bf16 %v370_v14, %v369_v13  ;;  %v372_v17 = vld [vmem:[#allocation8 + $0x18] sm:$0xff]  ;;  %v373_v19 = vld [vmem:[#allocation8 + $0x20] sm:$0xff] }
  0x5c   :  { %v825_v18 = vpack.c.bf16 %v372_v17, %v371_v15  ;;  %v374_v20 = vld [vmem:[#allocation8 + $0x28] sm:$0xff]  ;;  %v375_v22 = vld [vmem:[#allocation8 + $0x30] sm:$0xff]  ;;  %v376_v23 = vld [vmem:[#allocation8 + $0x38] sm:$0xff] }
  0x5d   :  { %763 = vmatpush3.bf16.msra.mxu0 %v762_v30  ;;  %v828_v21 = vpack.c.bf16 %v374_v20, %v373_v19  ;;  %v831_v24 = vpack.c.bf16 %v376_v23, %v375_v22  ;;  %v377_v25 = vld [vmem:[#allocation8 + $0x40] sm:$0xff]  ;;  %v378_v26 = vld [vmem:[#allocation8 + $0x48] sm:$0xff]  ;;  %v379_v28 = vld [vmem:[#allocation8 + $0x50] sm:$0xff] }
  0x5e   :  { %787 = vmatpush3.bf16.msra.mxu1 %v786_v31  ;;  %764 = vmatprep.subr.bf16.mxu0 %v985_v0  ;;  %v834_v27 = vpack.c.bf16 %v378_v26, %v377_v25  ;;  %v380_v29 = vld [vmem:[#allocation8 + $0x58] sm:$0xff]  ;;  %v381_v31 = vld [vmem:[#allocation8 + $0x60] sm:$0xff]  ;;  %v382_v32 = vld [vmem:[#allocation8 + $0x68] sm:$0xff] }
  0x5f   :  { %788 = vmatprep.subr.bf16.mxu1 %v985_v0  ;;  %v837_v30 = vpack.c.bf16 %v380_v29, %v379_v28  ;;  %v840_v33 = vpack.c.bf16 %v382_v32, %v381_v31 }
  0x61   :  { %766 = vmatpush3.bf16.msra.mxu0 %v765_v36  ;;  %v538_v36 = vld [vmem:[%s1208_s4] ss:$0 sm:$0xff] }
  0x62   :  { %790 = vmatpush3.bf16.msra.mxu1 %v789_v37  ;;  %767 = vmatprep.subr.bf16.mxu0 %v985_v0 }
  0x63   :  { %791 = vmatprep.subr.bf16.mxu1 %v985_v0 }
  0x65   :  { %769 = vmatpush3.bf16.msra.mxu0 %v768_v42  ;;  %v383_v42 = vld [vmem:[#allocation8 + $0x70] sm:$0xff] }
  0x66   :  { %793 = vmatpush3.bf16.msra.mxu1 %v792_v43  ;;  %770 = vmatprep.subr.bf16.mxu0 %v985_v0  ;;  %v384_v43 = vld [vmem:[#allocation8 + $0x78] sm:$0xff] }
  0x67   :  { %794 = vmatprep.subr.bf16.mxu1 %v985_v0  ;;  %v843_v44 = vpack.c.bf16 %v384_v43, %v383_v42 }
  0x69   :  { %772 = vmatpush3.bf16.msra.mxu0 %v771_v48  ;;  %v540_v48 = vld [vmem:[%s1212_s8] ss:$0 sm:$0xff] }
  0x6a   :  { %796 = vmatpush3.bf16.msra.mxu1 %v795_v49  ;;  %797 = vmatprep.subr.bf16.mxu0 %v985_v0 }
  0x6b   :  { %821 = vmatprep.subr.bf16.mxu1 %v985_v0 }
  0x6c   :  { %642 = vmatmul.mubr.f32.vlgmr.msra.gmra.mrb[0].mxu0 %v93_v52 }
  0x6d   :  { %677 = vmatmul.mubr.f32.vlgmr.msra.gmra.mrb[0].mxu1 %v92_v54  ;;  %799 = vmatpush3.bf16.msra.mxu0 %v798_v53 }
  0x6e   :  { %800 = vmatprep.subr.bf16.mxu0 %v985_v0  ;;  %711 = vmatprep.mubr.msk.f32.mxu0 %vm986_vm0, %v987_v1 }
  0x6f   :  { %746 = vmatprep.mubr.msk.f32.mxu1 %vm986_vm0, %v987_v1  ;;  %v813_v1 = vpack.c.bf16 %v286_v6, %v285_v5  ;;  %823 = vmatpush3.bf16.msra.mxu1 %v822_v16 }
  0x70   :  { %824 = vmatprep.subr.bf16.mxu1 %v985_v0 }
  0x71   :  { %802 = vmatpush3.bf16.msra.mxu0 %v801_v57  ;;  %v475_v57 = vlaneseq }
  0x72   :  { %803 = vmatprep.subr.bf16.mxu0 %v985_v0 }
  0x73   :  { %826 = vmatpush3.bf16.msra.mxu1 %v825_v18  ;;  %v476_v58 = vshrl.u32 %v475_v57, 7  ;;  %v480_v59 = vand.u32 127, %v475_v57 }
  0x74   :  { %827 = vmatprep.subr.bf16.mxu1 %v985_v0 }
  0x75   :  { %805 = vmatpush3.bf16.msra.mxu0 %v804_v60  ;;  %vm481_vm1 = vcmp.lt.s32.totalorder %v476_v58, 2  ;;  %vm482_vm2 = vcmp.lt.s32.totalorder %v480_v59, 5  ;;  %v485_v3 = vmul.u32 5, %v476_v58 }
  0x76   :  { %806 = vmatprep.subr.bf16.mxu0 %v985_v0  ;;  %vm483_vm3 = vmand %vm481_vm1, %vm482_vm2 }
  0x77   :  { %829 = vmatpush3.bf16.msra.mxu1 %v828_v21  ;;  %v486_v6 = vadd.s32 %v485_v3, %v480_v59 }
  0x78   :  { %830 = vmatprep.subr.bf16.mxu1 %v985_v0 }
  0x79   :  { %808 = vmatpush3.bf16.msra.mxu0 %v807_v63  ;;  %v487_v8 = vcvt.s32.f32 %v486_v6 }
  0x7a   :  { %809 = vmatprep.subr.bf16.mxu0 %v985_v0 }
  0x7b   :  { %832 = vmatpush3.bf16.msra.mxu1 %v831_v24 }
  0x7c   :  { %833 = vmatprep.subr.bf16.mxu1 %v985_v0 }
  0x7d   :  { %811 = vmatpush3.bf16.msra.mxu0 %v810_v4 }
  0x7e   :  { %812 = vmatprep.subr.bf16.mxu0 %v985_v0 }
  0x7f   :  { %835 = vmatpush3.bf16.msra.mxu1 %v834_v27 }
  0x80   :  { %836 = vmatprep.subr.bf16.mxu1 %v985_v0 }
  0x81   :  { %814 = vmatpush3.bf16.msra.mxu0 %v813_v1 }
  0x82   :  { %815 = vmatprep.subr.bf16.mxu0 %v985_v0 }
  0x83   :  { %838 = vmatpush3.bf16.msra.mxu1 %v837_v30 }
  0x84   :  { %839 = vmatprep.subr.bf16.mxu1 %v985_v0 }
  0x85   :  { %817 = vmatpush3.bf16.msra.mxu0 %v816_v9 }
  0x86   :  { %818 = vmatprep.subr.bf16.mxu0 %v985_v0 }
  0x87   :  { %841 = vmatpush3.bf16.msra.mxu1 %v840_v33 }
  0x88   :  { %842 = vmatprep.subr.bf16.mxu1 %v985_v0  ;;  %v539_v0 = vld [vmem:[%s1210_s6] ss:$0 sm:$0xff] }
  0x89   :  { %820 = vmatpush3.bf16.msra.mxu0 %v819_v12 }
  0x8b   :  { %844 = vmatpush3.bf16.msra.mxu1 %v843_v44 }
 0x13f   :  { %v192_v34 = vpop.f32.mrb[0].mxu0 }
 0x140   :  { %v262_v35 = vpop.f32.mrb[0].mxu1  ;;  %v643_v37 = vpop.f32.mrb[1].mxu0 }
 0x141   :  { %v263_v38 = vadd.f32 %v262_v35, %v192_v34  ;;  %v678_v39 = vpop.f32.mrb[1].mxu1 }
 0x143   :  { %v273_v40 = vadd.f32 %v538_v36, %v263_v38 }
 0x145   :  { %v274_v41 = vmax.f32 %v273_v40, 0.0 }
 0x147   :  { %712 = vmatmul.mubr.f32.vlgmr.msra.gmra.mrb[2].mxu0 %v274_v41 }
 0x21a   :  { %v364_v45 = vpop.f32.mrb[2].mxu0 }
 0x21b   :  { %v365_v46 = vadd.f32 %v539_v0, %v364_v45  ;;  %v713_v47 = vpop.f32.mrb[3].mxu0 }
 0x21d   :  { %368 = vst [vmem:[%s1213_s9] sm:$0xff] %v365_v46  ;;  %747 = vmatmul.mubr.f32.vlgmr.msra.gmra.mrb[2].mxu1 %v365_v46  ;;  %s988_s9 = smov [#allocation10]  }
 0x21e   :  { %s519_s2 = sshll.u32 %s988_s9, 4  ;;  %s520_s2 = int_to_ptr.vmem [resolvable:$true] %s519_s2 }
 0x21f   :  { %s949_s24 = scalar_lea.vmem %s520_s2, 128  ;;  %p954_p5 = scmp.lt.s32.totalorder %s520_s2, %s520_s2 }
 0x220   :  { %p950_p4 = scmp.ne.s32.totalorder %s520_s2, %s949_s24  ;;  %p955_p6 = scmp.lt.s32.totalorder %s949_s24, %s949_s24 }
 0x222   :  { %p956_p7 = por %p955_p6, %p954_p5 }
 0x224   :  { %p957_p8 = pnand %p956_p7, %p950_p4 }
 0x2f0   :  { %v458_v49 = vpop.f32.mrb[2].mxu1 }
 0x2f1   :  { %v459_v50 = vadd.f32 %v540_v48, %v458_v49  ;;  %v748_v51 = vpop.f32.mrb[3].mxu1 }
 0x2f3   :  { %462 = vmax.xlane.f32.xlu0 %v459_v50 }
 0x380   :  { %v463_v52 = vpop.xlane.xlu0 %462 }
 0x381   :  { %v464_v53 = vsub.f32 %v459_v50, %v463_v52 }
 0x383   :  { %v465_v54 = vmul.f32 1.442695, %v464_v53 }
 0x385   :  { %857 = vpow2.f32 %v465_v54 }
 0x38f   :  { %v858_v55 = vpop.eup %857 }
 0x390   :  { %467 = vadd.xlane.f32.xlu0 %v858_v55 }
 0x41d   :  { %v468_v56 = vpop.xlane.xlu0 %467 }
 0x41e   :  { %859 = vrcp.f32 %v468_v56 }
 0x428   :  { %v860_v60 = vpop.eup %859 }
 0x429   :  { %v470_v61 = vmul.f32 %v860_v60, %v858_v55 }
 0x42b   :  { %v484_v62 = vsel %vm483_vm3, %v470_v61, -1.0  ;;  %471 = vst [vmem:[%s1214_s10] sm:$0xff] %v470_v61 }
 0x42c   :  { %488 = vmax.xlane.f32.xlu1 %v484_v62 }
 0x4b9   :  { %v489_v63 = vpop.xlane.xlu1 %488 }
 0x4ba   :  { %v490_v2 = vrot.slane %v489_v63, 4 }
 0x4bc   :  { %v491_v4 = vmax.f32 %v489_v63, %v490_v2 }
 0x4be   :  { %v492_v5 = vrot.slane %v491_v4, 2 }
 0x4c0   :  { %v493_v1 = vmax.f32 %v491_v4, %v492_v5 }
 0x4c2   :  { %v494_v7 = vrot.slane %v493_v1, 1 }
 0x4c4   :  { %v495_v9 = vmax.f32 %v493_v1, %v494_v7 }
 0x4c6   :  { %vm496_vm4 = vcmp.eq.f32.partialorder %v484_v62, %v495_v9  ;;  %506 = vst [vmem:[#allocation10] sm:$0xff] %v495_v9 }
 0x4c7   :  { %v497_v10 = vsel %vm496_vm4, %v487_v8, 3e+38 }
 0x4c8   :  { %498 = vmin.xlane.f32.xlu1 %v497_v10 }
 0x4c9   :  { %960 = shalt.err (!%p957_p8)
}
 0x4ca   :  { %s961_s27 = scalar_lea.hbm %s1215_s11, 128 }
 0x4cb   :  { %p962_p9 = scmp.ne.s32.totalorder %s1215_s11, %s961_s27  ;;  %p965_p10 = scmp.lt.u32.totalorder %s961_s27, %s1215_s11 }
 0x4cd   :  { %p967_p11 = pnand %p965_p10, %p962_p9 }
 0x4cf   :  { %970 = shalt.err (!%p967_p11)
}
 0x4d0   :  { %522 = dma.vmem_to_hbm [thread:$0]  %s520_s2, 128, %s1215_s11, [#allocation4]  }
 0x555   :  { %v499_v11 = vpop.xlane.xlu1 %498 }
 0x556   :  { %v500_v12 = vrot.slane %v499_v11, 4 }
 0x558   :  { %v501_v13 = vmin.f32 %v499_v11, %v500_v12 }
 0x55a   :  { %v502_v14 = vrot.slane %v501_v13, 2 }
 0x55c   :  { %v503_v15 = vmin.f32 %v501_v13, %v502_v14 }
 0x55e   :  { %v504_v16 = vrot.slane %v503_v15, 1 }
 0x560   :  { %v505_v17 = vmin.f32 %v503_v15, %v504_v16 }
 0x562   :  { %v845_v18 = vtrunc.f32 %v505_v17 }
 0x564   :  { %v846_v19 = vcvt.f32.s32 %v845_v18 }
 0x566   :  { %508 = vst [vmem:[%s1216_s12] sm:$0xff] %v846_v19 }
 0x567   :  { %977 = dma.done.wait [#allocation4], 128  }
 0x568   :  { %978 = vsyncadd [#allocation4], 4294967168 }
 0x569   :  { %534 = vsyncpa [#allocation3], 1 }
 0x56a   :  { %535 = vsyncpa [#allocation6], 1 }
 0x56b   :  { %536 = vsyncpa [#allocation9], 1 }
 0x56c   :  { %537 = vsyncpa [#allocation4], 1 }

</bundles_post_ra>
